<compile_context>
chip_gen: v7x
topology: tpu7x:2x2x1
jax: 0.10.0
libtpu: 0.0.40
codegen_flags: <defaults>
</compile_context>

<pallas_src>
import functools
import math

import jax
import jax.numpy as jnp
from jax.experimental import pallas as pl
from jax.experimental.pallas import tpu as pltpu


_LANE = 128


def _round_up(x: int, m: int) -> int:
    return (x + m - 1) // m * m


def _sublane_multiple(dtype) -> int:
    """Min second-minor tile: 8 for 4-byte, 16 for 2-byte, 32 for 1-byte dtypes."""
    itemsize = jnp.dtype(dtype).itemsize
    return {4: 8, 2: 16, 1: 32}.get(itemsize, 8)


# ----------------------------- Pallas kernel -------------------------------

def _tokenizer_kernel(x_ref, w_ref, *rest, n_features: int, d_token: int,
                      has_bias: bool):
    """One batch tile: o[b, f*D + d] = x[b, f] * w[f, d] (+ bias[f, d]).

    x_ref: (TB, F)   w_ref/b_ref: (F, D)   o_ref: (TB, F*D)  (lane-dense)
    """
    if has_bias:
        b_ref, o_ref = rest
    else:
        (o_ref,) = rest

    x = x_ref[...]                       # (TB, F)
    w = w_ref[...]                       # (F, D)
    b = b_ref[...] if has_bias else None

    # Statically-unrolled per-feature segments: (TB,1)*(1,D) is a native
    # lane-broadcast x sublane-broadcast; stores land in the lane-dense flat
    # output row. No relayouts, no in-kernel reshapes.
    for f in range(n_features):
        seg = x[:, f:f + 1] * w[f:f + 1, :]
        if has_bias:
            seg = seg + b[f:f + 1, :]
        o_ref[:, f * d_token:(f + 1) * d_token] = seg.astype(o_ref.dtype)


# ------------------------------- Wrapper ------------------------------------

def numerical_feature_tokenizer(x: jax.Array,
                                weight: jax.Array,
                                bias: jax.Array | None = None,
                                *,
                                block_bytes: int = 12 * 2**20) -> jax.Array:
    """x: (B, n_features); weight/bias: (n_features, d_token) -> (B, n_features, d_token)."""
    B, F = x.shape
    Fw, D = weight.shape
    assert F == Fw, "x feature dim must match weight rows"
    dtype = x.dtype
    itemsize = jnp.dtype(dtype).itemsize
    has_bias = bias is not None
    SUB = _sublane_multiple(dtype)
    FD = F * D

    # ---- VMEM budgeting for the batch tile TB -------------------------------
    # Per batch row, double-buffered: output block row (minor dim lane-padded
    # to 128) + x block row (F lane-padded to 128).
    row_bytes = 2 * (_round_up(FD, _LANE) + _round_up(F, _LANE)) * itemsize
    # Resident (grid-invariant, but allocated double-buffered) weight/bias.
    resident_bytes = (2 if has_bias else 1) * 2 * _round_up(F, SUB) * \
        _round_up(D, _LANE) * itemsize
    tb_budget = max(SUB, max(block_bytes - resident_bytes, 0) // max(row_bytes, 1))
    tb_budget = max(SUB, tb_budget // SUB * SUB)

    if B <= tb_budget:
        TB, B_pad = B, B                       # single grid step, no padding
    else:
        TB = 0
        for cand in range(tb_budget, SUB - 1, -SUB):
            if B % cand == 0:                  # exact divisor -> no padding/slice
                TB = cand
                break
        if TB:
            B_pad = B
        else:                                  # awkward batch: pad + final slice
            TB = tb_budget
            B_pad = _round_up(B, TB)

    x2 = x if B_pad == B else jnp.zeros((B_pad, F), dtype).at[:B].set(x)

    args = [x2, weight]
    in_specs = [
        pl.BlockSpec((TB, F), lambda i: (i, 0)),       # batch-tiled x (2-D)
        pl.BlockSpec((F, D), lambda i: (0, 0)),        # weight (grid-invariant)
    ]
    if has_bias:
        args.append(bias)
        in_specs.append(pl.BlockSpec((F, D), lambda i: (0, 0)))

    grid = (B_pad // TB,)
    vmem_need = TB * row_bytes + resident_bytes
    vmem_limit = int(min(max(2 * vmem_need, 32 * 2**20), 48 * 2**20))

    cost = pl.CostEstimate(
        flops=int((2 if has_bias else 1) * B_pad * FD),
        transcendentals=0,
        bytes_accessed=int((B_pad * FD + B_pad * F +
                            (2 if has_bias else 1) * FD) * itemsize),
    )

    kernel = functools.partial(_tokenizer_kernel, n_features=F, d_token=D,
                               has_bias=has_bias)

    out = pl.pallas_call(
        kernel,
        out_shape=jax.ShapeDtypeStruct((B_pad, FD), dtype),
        grid=grid,
        in_specs=in_specs,
        out_specs=pl.BlockSpec((TB, FD), lambda i: (i, 0)),
        compiler_params=pltpu.CompilerParams(
            dimension_semantics=("parallel",),
            vmem_limit_bytes=vmem_limit,
        ),
        cost_estimate=cost,
    )(*args)

    if B_pad != B:
        out = out[:B]
    # Row-major (B, F*D) -> (B, F, D) is layout-preserving (free).
    return out.reshape(B, F, D)


# ----------------------------- Parameter init ------------------------------

def make_tokenizer_params(key, n_features: int, d_token: int, bias: bool,
                          initialization: str = "uniform", dtype=jnp.float32):
    """Mimics _TokenInitialization: U[-1/sqrt(d), 1/sqrt(d)] or N(0, 1/sqrt(d))."""
    kw, kb = jax.random.split(key)
    d_sqrt_inv = 1.0 / math.sqrt(d_token)
    if initialization == "uniform":
        w = jax.random.uniform(kw, (n_features, d_token), dtype,
                               minval=-d_sqrt_inv, maxval=d_sqrt_inv)
        b = (jax.random.uniform(kb, (n_features, d_token), dtype,
                                minval=-d_sqrt_inv, maxval=d_sqrt_inv)
             if bias else None)
    elif initialization == "normal":
        w = jax.random.normal(kw, (n_features, d_token), dtype) * d_sqrt_inv
        b = (jax.random.normal(kb, (n_features, d_token), dtype) * d_sqrt_inv
             if bias else None)
    else:
        raise ValueError("initialization must be 'uniform' or 'normal'")
    return w, b


# Pure-JAX reference for sanity checking.
def tokenizer_ref(x, weight, bias=None):
    y = weight[None] * x[..., None]
    if bias is not None:
        y = y + bias[None]
    return y


# ---------------------------------- main ------------------------------------

if __name__ == "__main__":
    key = jax.random.PRNGKey(0)
    kx, kp, kx2, kp2 = jax.random.split(key, 4)

    # Small shapes consistent with the module: batch=2, n_features=8, d_token=32.
    batch, n_features, d_token = 2, 8, 32
    x = jax.random.normal(kx, (batch, n_features), dtype=jnp.float32)
    weight, bias = make_tokenizer_params(kp, n_features, d_token,
                                         bias=True, initialization="uniform")

    # With bias.
    y = jax.block_until_ready(numerical_feature_tokenizer(x, weight, bias))
    assert y.shape == (batch, n_features, d_token)
    assert jnp.allclose(y, tokenizer_ref(x, weight, bias), atol=1e-6, rtol=1e-6)

    # Without bias (the module's bias=False path).
    y_nb = jax.block_until_ready(numerical_feature_tokenizer(x, weight, None))
    assert jnp.allclose(y_nb, tokenizer_ref(x, weight, None), atol=1e-6, rtol=1e-6)

    # Exercise the multi-step grid and batch-padding paths with awkward shapes
    # (B not a multiple of 8, F*D not a multiple of 128) by shrinking the
    # per-call block budget.
    b2, f2, d2 = 50, 7, 24
    x2 = jax.random.normal(kx2, (b2, f2), dtype=jnp.float32)
    w2, bi2 = make_tokenizer_params(kp2, f2, d2, bias=True)
    y2 = jax.block_until_ready(
        numerical_feature_tokenizer(x2, w2, bi2, block_bytes=64 * 1024))
    assert y2.shape == (b2, f2, d2)
    assert jnp.allclose(y2, tokenizer_ref(x2, w2, bi2), atol=1e-6, rtol=1e-6)

    print("KERNEL_OK")
</pallas_src>

<mosaic_0001>
module attributes {stable_mosaic.version = 11 : i64} {
  func.func @_tokenizer_kernel(%arg0: i32, %arg1: memref<2x8xf32, #tpu.memory_space<vmem>>, %arg2: memref<8x32xf32, #tpu.memory_space<vmem>>, %arg3: memref<8x32xf32, #tpu.memory_space<vmem>>, %arg4: memref<2x256xf32, #tpu.memory_space<vmem>>) attributes {dimension_semantics = [#tpu.dimension_semantics<parallel>], iteration_bounds = array<i64: 1>, scalar_prefetch = 0 : i64, scratch_operands = 0 : i64, tpu.core_type = #tpu.core_type<tc>, window_params = [{transform_indices = @transform_0, window_bounds = array<i64: 2, 8>}, {pipeline_mode = #tpu.pipeline_mode<synchronous>, transform_indices = @transform_1, window_bounds = array<i64: 8, 32>}, {pipeline_mode = #tpu.pipeline_mode<synchronous>, transform_indices = @transform_2, window_bounds = array<i64: 8, 32>}, {transform_indices = @transform_3, window_bounds = array<i64: 2, 256>}]} {
    %c0 = arith.constant 0 : index
    %c0_0 = arith.constant 0 : index
    %0 = vector.load %arg1[%c0, %c0_0] : memref<2x8xf32, #tpu.memory_space<vmem>>, vector<2x8xf32>
    %c0_1 = arith.constant 0 : index
    %c0_2 = arith.constant 0 : index
    %1 = vector.load %arg2[%c0_1, %c0_2] : memref<8x32xf32, #tpu.memory_space<vmem>>, vector<8x32xf32>
    %c0_3 = arith.constant 0 : index
    %c0_4 = arith.constant 0 : index
    %2 = vector.load %arg3[%c0_3, %c0_4] : memref<8x32xf32, #tpu.memory_space<vmem>>, vector<8x32xf32>
    %3 = vector.extract_strided_slice %0 {offsets = [0, 0], sizes = [2, 1], strides = [1, 1]} : vector<2x8xf32> to vector<2x1xf32>
    %4 = vector.extract_strided_slice %1 {offsets = [0, 0], sizes = [1, 32], strides = [1, 1]} : vector<8x32xf32> to vector<1x32xf32>
    %5 = vector.broadcast %3 : vector<2x1xf32> to vector<2x32xf32>
    %6 = vector.broadcast %4 : vector<1x32xf32> to vector<2x32xf32>
    %7 = arith.mulf %5, %6 : vector<2x32xf32>
    %8 = vector.extract_strided_slice %2 {offsets = [0, 0], sizes = [1, 32], strides = [1, 1]} : vector<8x32xf32> to vector<1x32xf32>
    %9 = vector.broadcast %8 : vector<1x32xf32> to vector<2x32xf32>
    %10 = arith.addf %7, %9 : vector<2x32xf32>
    %c0_5 = arith.constant 0 : index
    %c0_6 = arith.constant 0 : index
    %11 = vector.load %arg4[%c0_5, %c0_6] : memref<2x256xf32, #tpu.memory_space<vmem>>, vector<2x32xf32>
    tpu.vector_store %arg4[%c0_5, %c0_6], %10 {strides = array<i32>} : memref<2x256xf32, #tpu.memory_space<vmem>>, vector<2x32xf32>,
    %12 = vector.extract_strided_slice %0 {offsets = [0, 1], sizes = [2, 1], strides = [1, 1]} : vector<2x8xf32> to vector<2x1xf32>
    %13 = vector.extract_strided_slice %1 {offsets = [1, 0], sizes = [1, 32], strides = [1, 1]} : vector<8x32xf32> to vector<1x32xf32>
    %14 = vector.broadcast %12 : vector<2x1xf32> to vector<2x32xf32>
    %15 = vector.broadcast %13 : vector<1x32xf32> to vector<2x32xf32>
    %16 = arith.mulf %14, %15 : vector<2x32xf32>
    %17 = vector.extract_strided_slice %2 {offsets = [1, 0], sizes = [1, 32], strides = [1, 1]} : vector<8x32xf32> to vector<1x32xf32>
    %18 = vector.broadcast %17 : vector<1x32xf32> to vector<2x32xf32>
    %19 = arith.addf %16, %18 : vector<2x32xf32>
    %c0_7 = arith.constant 0 : index
    %c32 = arith.constant 32 : index
    %20 = vector.load %arg4[%c0_7, %c32] : memref<2x256xf32, #tpu.memory_space<vmem>>, vector<2x32xf32>
    tpu.vector_store %arg4[%c0_7, %c32], %19 {strides = array<i32>} : memref<2x256xf32, #tpu.memory_space<vmem>>, vector<2x32xf32>,
    %21 = vector.extract_strided_slice %0 {offsets = [0, 2], sizes = [2, 1], strides = [1, 1]} : vector<2x8xf32> to vector<2x1xf32>
    %22 = vector.extract_strided_slice %1 {offsets = [2, 0], sizes = [1, 32], strides = [1, 1]} : vector<8x32xf32> to vector<1x32xf32>
    %23 = vector.broadcast %21 : vector<2x1xf32> to vector<2x32xf32>
    %24 = vector.broadcast %22 : vector<1x32xf32> to vector<2x32xf32>
    %25 = arith.mulf %23, %24 : vector<2x32xf32>
    %26 = vector.extract_strided_slice %2 {offsets = [2, 0], sizes = [1, 32], strides = [1, 1]} : vector<8x32xf32> to vector<1x32xf32>
    %27 = vector.broadcast %26 : vector<1x32xf32> to vector<2x32xf32>
    %28 = arith.addf %25, %27 : vector<2x32xf32>
    %c0_8 = arith.constant 0 : index
    %c64 = arith.constant 64 : index
    %29 = vector.load %arg4[%c0_8, %c64] : memref<2x256xf32, #tpu.memory_space<vmem>>, vector<2x32xf32>
    tpu.vector_store %arg4[%c0_8, %c64], %28 {strides = array<i32>} : memref<2x256xf32, #tpu.memory_space<vmem>>, vector<2x32xf32>,
    %30 = vector.extract_strided_slice %0 {offsets = [0, 3], sizes = [2, 1], strides = [1, 1]} : vector<2x8xf32> to vector<2x1xf32>
    %31 = vector.extract_strided_slice %1 {offsets = [3, 0], sizes = [1, 32], strides = [1, 1]} : vector<8x32xf32> to vector<1x32xf32>
    %32 = vector.broadcast %30 : vector<2x1xf32> to vector<2x32xf32>
    %33 = vector.broadcast %31 : vector<1x32xf32> to vector<2x32xf32>
    %34 = arith.mulf %32, %33 : vector<2x32xf32>
    %35 = vector.extract_strided_slice %2 {offsets = [3, 0], sizes = [1, 32], strides = [1, 1]} : vector<8x32xf32> to vector<1x32xf32>
    %36 = vector.broadcast %35 : vector<1x32xf32> to vector<2x32xf32>
    %37 = arith.addf %34, %36 : vector<2x32xf32>
    %c0_9 = arith.constant 0 : index
    %c96 = arith.constant 96 : index
    %38 = vector.load %arg4[%c0_9, %c96] : memref<2x256xf32, #tpu.memory_space<vmem>>, vector<2x32xf32>
    tpu.vector_store %arg4[%c0_9, %c96], %37 {strides = array<i32>} : memref<2x256xf32, #tpu.memory_space<vmem>>, vector<2x32xf32>,
    %39 = vector.extract_strided_slice %0 {offsets = [0, 4], sizes = [2, 1], strides = [1, 1]} : vector<2x8xf32> to vector<2x1xf32>
    %40 = vector.extract_strided_slice %1 {offsets = [4, 0], sizes = [1, 32], strides = [1, 1]} : vector<8x32xf32> to vector<1x32xf32>
    %41 = vector.broadcast %39 : vector<2x1xf32> to vector<2x32xf32>
    %42 = vector.broadcast %40 : vector<1x32xf32> to vector<2x32xf32>
    %43 = arith.mulf %41, %42 : vector<2x32xf32>
    %44 = vector.extract_strided_slice %2 {offsets = [4, 0], sizes = [1, 32], strides = [1, 1]} : vector<8x32xf32> to vector<1x32xf32>
    %45 = vector.broadcast %44 : vector<1x32xf32> to vector<2x32xf32>
    %46 = arith.addf %43, %45 : vector<2x32xf32>
    %c0_10 = arith.constant 0 : index
    %c128 = arith.constant 128 : index
    %47 = vector.load %arg4[%c0_10, %c128] : memref<2x256xf32, #tpu.memory_space<vmem>>, vector<2x32xf32>
    tpu.vector_store %arg4[%c0_10, %c128], %46 {strides = array<i32>} : memref<2x256xf32, #tpu.memory_space<vmem>>, vector<2x32xf32>,
    %48 = vector.extract_strided_slice %0 {offsets = [0, 5], sizes = [2, 1], strides = [1, 1]} : vector<2x8xf32> to vector<2x1xf32>
    %49 = vector.extract_strided_slice %1 {offsets = [5, 0], sizes = [1, 32], strides = [1, 1]} : vector<8x32xf32> to vector<1x32xf32>
    %50 = vector.broadcast %48 : vector<2x1xf32> to vector<2x32xf32>
    %51 = vector.broadcast %49 : vector<1x32xf32> to vector<2x32xf32>
    %52 = arith.mulf %50, %51 : vector<2x32xf32>
    %53 = vector.extract_strided_slice %2 {offsets = [5, 0], sizes = [1, 32], strides = [1, 1]} : vector<8x32xf32> to vector<1x32xf32>
    %54 = vector.broadcast %53 : vector<1x32xf32> to vector<2x32xf32>
    %55 = arith.addf %52, %54 : vector<2x32xf32>
    %c0_11 = arith.constant 0 : index
    %c160 = arith.constant 160 : index
    %56 = vector.load %arg4[%c0_11, %c160] : memref<2x256xf32, #tpu.memory_space<vmem>>, vector<2x32xf32>
    tpu.vector_store %arg4[%c0_11, %c160], %55 {strides = array<i32>} : memref<2x256xf32, #tpu.memory_space<vmem>>, vector<2x32xf32>,
    %57 = vector.extract_strided_slice %0 {offsets = [0, 6], sizes = [2, 1], strides = [1, 1]} : vector<2x8xf32> to vector<2x1xf32>
    %58 = vector.extract_strided_slice %1 {offsets = [6, 0], sizes = [1, 32], strides = [1, 1]} : vector<8x32xf32> to vector<1x32xf32>
    %59 = vector.broadcast %57 : vector<2x1xf32> to vector<2x32xf32>
    %60 = vector.broadcast %58 : vector<1x32xf32> to vector<2x32xf32>
    %61 = arith.mulf %59, %60 : vector<2x32xf32>
    %62 = vector.extract_strided_slice %2 {offsets = [6, 0], sizes = [1, 32], strides = [1, 1]} : vector<8x32xf32> to vector<1x32xf32>
    %63 = vector.broadcast %62 : vector<1x32xf32> to vector<2x32xf32>
    %64 = arith.addf %61, %63 : vector<2x32xf32>
    %c0_12 = arith.constant 0 : index
    %c192 = arith.constant 192 : index
    %65 = vector.load %arg4[%c0_12, %c192] : memref<2x256xf32, #tpu.memory_space<vmem>>, vector<2x32xf32>
    tpu.vector_store %arg4[%c0_12, %c192], %64 {strides = array<i32>} : memref<2x256xf32, #tpu.memory_space<vmem>>, vector<2x32xf32>,
    %66 = vector.extract_strided_slice %0 {offsets = [0, 7], sizes = [2, 1], strides = [1, 1]} : vector<2x8xf32> to vector<2x1xf32>
    %67 = vector.extract_strided_slice %1 {offsets = [7, 0], sizes = [1, 32], strides = [1, 1]} : vector<8x32xf32> to vector<1x32xf32>
    %68 = vector.broadcast %66 : vector<2x1xf32> to vector<2x32xf32>
    %69 = vector.broadcast %67 : vector<1x32xf32> to vector<2x32xf32>
    %70 = arith.mulf %68, %69 : vector<2x32xf32>
    %71 = vector.extract_strided_slice %2 {offsets = [7, 0], sizes = [1, 32], strides = [1, 1]} : vector<8x32xf32> to vector<1x32xf32>
    %72 = vector.broadcast %71 : vector<1x32xf32> to vector<2x32xf32>
    %73 = arith.addf %70, %72 : vector<2x32xf32>
    %c0_13 = arith.constant 0 : index
    %c224 = arith.constant 224 : index
    %74 = vector.load %arg4[%c0_13, %c224] : memref<2x256xf32, #tpu.memory_space<vmem>>, vector<2x32xf32>
    tpu.vector_store %arg4[%c0_13, %c224], %73 {strides = array<i32>} : memref<2x256xf32, #tpu.memory_space<vmem>>, vector<2x32xf32>,
    return
  }
  func.func @transform_0(%arg0: i32) -> (i32, i32) {
    %c0_i32 = arith.constant 0 : i32
    %c0_i32_0 = arith.constant 0 : i32
    return %arg0, %c0_i32 : i32, i32
  }
  func.func @transform_1(%arg0: i32) -> (i32, i32) {
    %c0_i32 = arith.constant 0 : i32
    %c0_i32_0 = arith.constant 0 : i32
    %c0_i32_1 = arith.constant 0 : i32
    return %c0_i32, %c0_i32_0 : i32, i32
  }
  func.func @transform_2(%arg0: i32) -> (i32, i32) {
    %c0_i32 = arith.constant 0 : i32
    %c0_i32_0 = arith.constant 0 : i32
    %c0_i32_1 = arith.constant 0 : i32
    return %c0_i32, %c0_i32_0 : i32, i32
  }
  func.func @transform_3(%arg0: i32) -> (i32, i32) {
    %c0_i32 = arith.constant 0 : i32
    %c0_i32_0 = arith.constant 0 : i32
    return %arg0, %c0_i32 : i32, i32
  }
}

</mosaic_0001>

<bundles_post_ra>
// kernel: tpu_custom_call.1
= control target key start
LH: loop header
LB: loop body
LE: loop exit
PB: predicated region body
PF: predicated region fallthrough
CT: control target
= control target key end

     0   :  { %8 = vsyncpa [#allocation3], 0  ;;  %s473_s0 = inlined_call_operand.hbm [shape: f32[2,8], index: 0, kind: input, shape index: {}]   ;;  %s474_s1 = inlined_call_operand.hbm [shape: f32[8,32], index: 1, kind: input, shape index: {}]   ;;  %s475_s2 = inlined_call_operand.hbm [shape: f32[8,32], index: 2, kind: input, shape index: {}]   ;;  %s476_s3 = inlined_call_operand.hbm [shape: f32[2,256], index: 3, kind: output, shape index: {}]  }
   0x1   :  { %9 = vsyncpa [#allocation6], 0 }
   0x2   :  { %10 = vsyncpa [#allocation4], 0  ;;  %s378_s12 = smov [#allocation5]   ;;  %s379_s14 = smov [#allocation2]  }
   0x3   :  { %s27_s13 = sshll.u32 %s378_s12, 4  ;;  %s17_s15 = sshll.u32 %s379_s14, 4  ;;  %s28_s13 = int_to_ptr.vmem [resolvable:$true] %s27_s13  ;;  %s18_s15 = int_to_ptr.vmem [resolvable:$true] %s17_s15 }
   0x4   :  { %s284_s18 = scalar_lea.hbm %s474_s1, 128 }
   0x5   :  { %p285_p0 = scmp.ne.s32.totalorder %s474_s1, %s284_s18  ;;  %p288_p1 = scmp.lt.u32.totalorder %s284_s18, %s474_s1 }
   0x7   :  { %p290_p2 = pnand %p288_p1, %p285_p0 }
   0x9   :  { %293 = shalt.err (!%p290_p2)
}
   0xa   :  { %s294_s23 = scalar_lea.vmem %s28_s13, 128  ;;  %p299_p4 = scmp.lt.s32.totalorder %s28_s13, %s28_s13 }
   0xb   :  { %p295_p3 = scmp.ne.s32.totalorder %s28_s13, %s294_s23  ;;  %p300_p5 = scmp.lt.s32.totalorder %s294_s23, %s294_s23 }
   0xd   :  { %p301_p6 = por %p300_p5, %p299_p4 }
   0xf   :  { %p302_p7 = pnand %p301_p6, %p295_p3 }
  0x11   :  { %305 = shalt.err (!%p302_p7)
}
  0x12   :  { %30 = dma.hbm_to_vmem [thread:$0]  %s474_s1, 128, %s28_s13, [#allocation6]  }
  0x13   :  { %s306_s28 = scalar_lea.hbm %s473_s0, 32 }
  0x14   :  { %p307_p8 = scmp.ne.s32.totalorder %s473_s0, %s306_s28  ;;  %p310_p9 = scmp.lt.u32.totalorder %s306_s28, %s473_s0 }
  0x16   :  { %p312_p10 = pnand %p310_p9, %p307_p8 }
  0x18   :  { %315 = shalt.err (!%p312_p10)
}
  0x19   :  { %s316_s6 = scalar_lea.vmem %s18_s15, 32  ;;  %p321_p12 = scmp.lt.s32.totalorder %s18_s15, %s18_s15 }
  0x1a   :  { %p317_p11 = scmp.ne.s32.totalorder %s18_s15, %s316_s6  ;;  %p322_p13 = scmp.lt.s32.totalorder %s316_s6, %s316_s6 }
  0x1c   :  { %p323_p0 = por %p322_p13, %p321_p12 }
  0x1e   :  { %p324_p1 = pnand %p323_p0, %p317_p11 }
  0x20   :  { %327 = shalt.err (!%p324_p1)
}
  0x21   :  { %20 = dma.hbm_to_vmem [thread:$0]  %s473_s0, 32, %s18_s15, [#allocation3]  }
  0x22   :  { %s380_s8 = smov [#allocation7]   ;;  %s328_s12 = scalar_lea.hbm %s475_s2, 128 }
  0x23   :  { %s37_s9 = sshll.u32 %s380_s8, 4  ;;  %p329_p2 = scmp.ne.s32.totalorder %s475_s2, %s328_s12  ;;  %s38_s9 = int_to_ptr.vmem [resolvable:$true] %s37_s9 }
  0x24   :  { %p332_p3 = scmp.lt.u32.totalorder %s328_s12, %s475_s2 }
  0x26   :  { %p334_p4 = pnand %p332_p3, %p329_p2 }
  0x28   :  { %337 = shalt.err (!%p334_p4)
}
  0x29   :  { %s338_s18 = scalar_lea.vmem %s38_s9, 128  ;;  %p343_p6 = scmp.lt.s32.totalorder %s38_s9, %s38_s9 }
  0x2a   :  { %p339_p5 = scmp.ne.s32.totalorder %s38_s9, %s338_s18  ;;  %p344_p7 = scmp.lt.s32.totalorder %s338_s18, %s338_s18 }
  0x2c   :  { %p345_p8 = por %p344_p7, %p343_p6 }
  0x2e   :  { %p346_p9 = pnand %p345_p8, %p339_p5 }
  0x30   :  { %349 = shalt.err (!%p346_p9)
}
  0x31   :  { %40 = dma.hbm_to_vmem [thread:$0]  %s475_s2, 128, %s38_s9, [#allocation6]  }
  0x32   :  { %372 = dma.done.wait [#allocation3], 32  }
  0x33   :  { %373 = vsyncadd [#allocation3], 4294967264 }
  0x34   :  { %374 = dma.done.wait [#allocation6], 256  }
  0x35   :  { %375 = vsyncadd [#allocation6], 4294967040  ;;  %v381_v0 = vmov 1   ;;  %v382_v1 = vmov 2   ;;  %v50_v2 = vld [vmem:[#allocation2] sm:$0x3]  ;;  %v58_v9 = vlaneseq }
  0x36   :  { %276 = vset.pattern.permute.xlu0 %v381_v0  ;;  %278 = vset.pattern.permute.xlu1 %v382_v1  ;;  %v383_v3 = vmov 5   ;;  %v384_v4 = vmov 6   ;;  %v385_v5 = vmov 3   ;;  %v386_v6 = vmov 7   ;;  %v51_v15 = vld [vmem:[#allocation5] sm:$0xff]  ;;  %v52_v16 = vld [vmem:[#allocation7] sm:$0xff] }
  0x37   :  { %71 = vperm.xlu0 %276, %v50_v2   ;;  %98 = vperm.xlu1 %278, %v50_v2   ;;  %v387_v7 = vmov 0   ;;  %v388_v8 = vmov 4   ;;  %v450_v10 = vshrl.u32 %v58_v9, 7  ;;  %v389_v13 = vmov 1983009808   ;;  %s390_s2 = smov 32  }
  0x38   :  { %v86_v14 = vunpack.c.l.s4 %v389_v13  ;;  %s391_s19 = smov 64   ;;  %s392_s20 = smov 96   ;;  %vm68_vm0 = vcmask 254976   ;;  %vm95_vm1 = vcmask 517376   ;;  %vm122_vm2 = vcmask 779776  }
  0x39   :  { %v76_v11 = vsub.s32 1, %v450_v10  ;;  %v103_v12 = vsub.s32 2, %v450_v10  ;;  %v172_v20 = vsub.s32 5, %v450_v10  ;;  %v198_v21 = vsub.s32 6, %v450_v10  ;;  %s393_s21 = smov [#allocation8]  }
  0x3a   :  { %v87_v19 = vunpack.c.0.s8 %v86_v14  ;;  %v130_v33 = vsub.s32 3, %v450_v10  ;;  %v224_v34 = vsub.s32 7, %v450_v10  ;;  %v60_v47 = vsub.s32 0, %v450_v10  ;;  %s250_s22 = sshll.u32 %s393_s21, 4  ;;  %s251_s22 = int_to_ptr.vmem [resolvable:$true] %s250_s22 }
  0x3b   :  { %277 = vset.pattern.permute.xlu0 %v383_v3  ;;  %279 = vset.pattern.permute.xlu1 %v384_v4  ;;  %v77_v17 = vrot.slane %v51_v15, %v76_v11  ;;  %v104_v18 = vrot.slane %v51_v15, %v103_v12  ;;  %v82_v22 = vrot.slane %v52_v16, %v76_v11  ;;  %v157_v59 = vsub.s32 4, %v450_v10  ;;  %s350_s23 = scalar_lea.vmem %s251_s22, 64  ;;  %p355_p11 = scmp.lt.s32.totalorder %s251_s22, %s251_s22 }
  0x3c   :  { %167 = vperm.xlu0 %277, %v50_v2   ;;  %193 = vperm.xlu1 %279, %v50_v2   ;;  %v109_v23 = vrot.slane %v52_v16, %v103_v12  ;;  %v90_v28 = vsub.s32 %v87_v19, %v450_v10  ;;  %v173_v29 = vrot.slane %v51_v15, %v172_v20  ;;  %vm149_vm3 = vcmask 1042176   ;;  %p351_p10 = scmp.ne.s32.totalorder %s251_s22, %s350_s23  ;;  %p356_p12 = scmp.lt.s32.totalorder %s350_s23, %s350_s23 }
  0x3d   :  { %v199_v30 = vrot.slane %v51_v15, %v198_v21  ;;  %v178_v35 = vrot.slane %v52_v16, %v172_v20  ;;  %v204_v36 = vrot.slane %v52_v16, %v198_v21  ;;  %v131_v43 = vrot.slane %v51_v15, %v130_v33 }
  0x3e   :  { %v225_v44 = vrot.slane %v51_v15, %v224_v34  ;;  %v136_v48 = vrot.slane %v52_v16, %v130_v33  ;;  %v230_v49 = vrot.slane %v52_v16, %v224_v34  ;;  %v61_v56 = vrot.slane %v51_v15, %v60_v47  ;;  %p357_p13 = por %p356_p12, %p355_p11 }
  0x3f   :  { %v66_v60 = vrot.slane %v52_v16, %v60_v47  ;;  %v158_v1 = vrot.slane %v51_v15, %v157_v59  ;;  %v163_v3 = vrot.slane %v52_v16, %v157_v59 }
  0x40   :  { %280 = vset.pattern.permute.xlu1 %v385_v5  ;;  %281 = vset.pattern.permute.xlu0 %v386_v6  ;;  %p358_p0 = pnand %p357_p13, %p351_p10 }
  0x41   :  { %125 = vperm.xlu1 %280, %v50_v2   ;;  %219 = vperm.xlu0 %281, %v50_v2  }
  0x45   :  { %282 = vset.pattern.permute.xlu1 %v387_v7 }
  0x46   :  { %55 = vperm.xlu1 %282, %v50_v2  }
  0x4a   :  { %283 = vset.pattern.permute.xlu1 %v388_v8 }
  0x4b   :  { %152 = vperm.xlu1 %283, %v50_v2  }
  0xb6   :  { %v72_v24 = vpop.permute.xlu0 %71  ;;  %v99_v25 = vpop.permute.xlu1 %98 }
  0xb7   :  { %v78_v26 = vmul.f32 %v77_v17, %v72_v24  ;;  %v105_v27 = vmul.f32 %v104_v18, %v99_v25 }
  0xb9   :  { %v83_v31 = vadd.f32 %v82_v22, %v78_v26  ;;  %v110_v32 = vadd.f32 %v109_v23, %v105_v27 }
  0xbb   :  { %v168_v37 = vpop.permute.xlu0 %167  ;;  %v91_v38 = vrot.slane %v83_v31, %v90_v28  ;;  %v194_v39 = vpop.permute.xlu1 %193  ;;  %v118_v42 = vrot.slane %v110_v32, %v90_v28 }
  0xbc   :  { %v174_v40 = vmul.f32 %v173_v29, %v168_v37  ;;  %v200_v41 = vmul.f32 %v199_v30, %v194_v39 }
  0xbd   :  { %92 = vrot.lane.b32.xlu0 %v91_v38, %s390_s2 }
  0xbe   :  { %v179_v45 = vadd.f32 %v178_v35, %v174_v40  ;;  %v205_v46 = vadd.f32 %v204_v36, %v200_v41 }
  0xc0   :  { %v187_v50 = vrot.slane %v179_v45, %v90_v28  ;;  %v126_v51 = vpop.permute.xlu1 %125  ;;  %v220_v52 = vpop.permute.xlu0 %219  ;;  %v213_v55 = vrot.slane %v205_v46, %v90_v28 }
  0xc1   :  { %119 = vrot.lane.b32.xlu0 %v118_v42, %s391_s19  ;;  %v132_v53 = vmul.f32 %v131_v43, %v126_v51  ;;  %v226_v54 = vmul.f32 %v225_v44, %v220_v52 }
  0xc2   :  { %188 = vrot.lane.b32.xlu1 %v187_v50, %s390_s2 }
  0xc3   :  { %v137_v57 = vadd.f32 %v136_v48, %v132_v53  ;;  %v231_v58 = vadd.f32 %v230_v49, %v226_v54 }
  0xc5   :  { %v145_v61 = vrot.slane %v137_v57, %v90_v28  ;;  %v56_v62 = vpop.permute.xlu1 %55  ;;  %v239_v63 = vrot.slane %v231_v58, %v90_v28 }
  0xc6   :  { %214 = vrot.lane.b32.xlu1 %v213_v55, %s391_s19  ;;  %v62_v0 = vmul.f32 %v61_v56, %v56_v62 }
  0xc7   :  { %146 = vrot.lane.b32.xlu0 %v145_v61, %s392_s20 }
  0xc8   :  { %v67_v2 = vadd.f32 %v66_v60, %v62_v0 }
  0xca   :  { %240 = vrot.lane.b32.xlu1 %v239_v63, %s392_s20  ;;  %69 = vst.msk [vmem:[#allocation8] sm:$0x3] %vm68_vm0, %v67_v2  ;;  %v153_v4 = vpop.permute.xlu1 %152 }
  0xcb   :  { %v159_v5 = vmul.f32 %v158_v1, %v153_v4 }
  0xcd   :  { %v164_v6 = vadd.f32 %v163_v3, %v159_v5 }
  0xcf   :  { %165 = vst.msk [vmem:[#allocation8 + $0x2] sm:$0x3] %vm68_vm0, %v164_v6 }
 0x12f   :  { %v93_v7 = vpop.permute.xlu0 %92 }
 0x130   :  { %96 = vst.msk [vmem:[#allocation8] sm:$0x3] %vm95_vm1, %v93_v7 }
 0x133   :  { %v120_v8 = vpop.permute.xlu0 %119 }
 0x134   :  { %123 = vst.msk [vmem:[#allocation8] sm:$0x3] %vm122_vm2, %v120_v8  ;;  %v189_v9 = vpop.permute.xlu1 %188 }
 0x135   :  { %191 = vst.msk [vmem:[#allocation8 + $0x2] sm:$0x3] %vm95_vm1, %v189_v9 }
 0x138   :  { %v215_v10 = vpop.permute.xlu1 %214 }
 0x139   :  { %217 = vst.msk [vmem:[#allocation8 + $0x2] sm:$0x3] %vm122_vm2, %v215_v10  ;;  %v147_v11 = vpop.permute.xlu0 %146 }
 0x13a   :  { %150 = vst.msk [vmem:[#allocation8] sm:$0x3] %vm149_vm3, %v147_v11 }
 0x13c   :  { %v241_v12 = vpop.permute.xlu1 %240 }
 0x13d   :  { %243 = vst.msk [vmem:[#allocation8 + $0x2] sm:$0x3] %vm149_vm3, %v241_v12 }
 0x13e   :  { %361 = shalt.err (!%p358_p0)
}
 0x13f   :  { %s362_s26 = scalar_lea.hbm %s476_s3, 64 }
 0x140   :  { %p363_p1 = scmp.ne.s32.totalorder %s476_s3, %s362_s26  ;;  %p366_p2 = scmp.lt.u32.totalorder %s362_s26, %s476_s3 }
 0x142   :  { %p368_p3 = pnand %p366_p2, %p363_p1 }
 0x144   :  { %371 = shalt.err (!%p368_p3)
}
 0x145   :  { %253 = dma.vmem_to_hbm [thread:$0]  %s251_s22, 64, %s476_s3, [#allocation4]  }
 0x146   :  { %376 = dma.done.wait [#allocation4], 64  }
 0x147   :  { %377 = vsyncadd [#allocation4], 4294967232 }
 0x148   :  { %257 = vsyncpa [#allocation3], 1 }
 0x149   :  { %258 = vsyncpa [#allocation6], 1 }
 0x14a   :  { %259 = vsyncpa [#allocation4], 1 }

</bundles_post_ra>
